<compile_context>
chip_gen: v6e
topology: v6e:2x2x1
jax: 0.10.0
libtpu: 0.0.40
codegen_flags: <defaults>
</compile_context>

<pallas_src>
import math

import jax
import jax.numpy as jnp
from jax.experimental import pallas as pl
from jax.experimental.pallas import tpu as pltpu


def make_ticket_embedding_params(key, features, embed_size):
    """Build the block-diagonal weight slab W[F*V_pad, round_up(F*D,128)].

    Returns (W, raw_tables, d_model, v_pad, embed_dim). Tables use N(0,1) init
    like torch.nn.Embedding.
    """
    if not isinstance(embed_size, (list, tuple)):
        embed_size = [embed_size] * len(features)
    assert len(set(embed_size)) == 1, "kernel assumes a single embed dim (int embeded_size)"
    d = embed_size[0]
    num_feat = len(features)
    v_pad = max(features)
    n_out = num_feat * d
    n_pad = 128 * pl.cdiv(n_out, 128)  # lane-dense output width

    w = jnp.zeros((num_feat * v_pad, n_pad), dtype=jnp.float32)
    raw_tables = []
    for i, f in enumerate(features):
        k = jax.random.fold_in(key, i)
        t = jax.random.normal(k, (f, d), dtype=jnp.float32)
        raw_tables.append(t)
        w = w.at[i * v_pad : i * v_pad + f, i * d : (i + 1) * d].set(t)

    d_model = int(sum(ff * dd for ff, dd in zip(features, embed_size)))
    return w, raw_tables, d_model, v_pad, d


def ticket_embedding_forward(xs, w, d_model, v_pad, embed_dim, *, tb=None):
    """xs: [B, F] int32, w: [F*V_pad, N_pad] f32 -> [B, F*embed_dim] f32."""
    B, F = xs.shape
    FV, n_pad = w.shape
    assert FV == F * v_pad
    n_out = F * embed_dim
    scale = math.sqrt(float(d_model))

    # Batch tile: multiple of 8 (sublane), up to 512 to amortize the ~0.35us
    # per-grid-step overhead and reach the HBM writeback roofline.
    if tb is None:
        tb = min(512, 8 * pl.cdiv(B, 8))
    b_pad = pl.cdiv(B, tb) * tb
    if b_pad != B:
        # pad with index 0 (valid for every table); padded rows sliced off below
        xs = jnp.pad(xs, ((0, b_pad - B), (0, 0)))

    def kernel(idx_ref, w_ref, out_ref):
        idx = idx_ref[...]  # [tb, F] int32, single load of the index tile
        # Loop-invariant iota over the flat (feature, vocab) axis, hoisted once.
        iota = jax.lax.broadcasted_iota(jnp.int32, (tb, FV), 1)
        # One-hot hit mask: feature i occupies lanes [i*V_pad, (i+1)*V_pad).
        hit = iota == idx[:, 0:1]
        for i in range(1, F):
            hit = hit | (iota == (idx[:, i : i + 1] + i * v_pad))
        onehot = jnp.where(hit, 1.0, 0.0).astype(jnp.float32)  # [tb, FV]
        # Single block-diagonal matmul -> lane-dense [tb, n_pad] result.
        # HIGHEST precision keeps the gathered f32 table values exact; the
        # sqrt(d_model) scale is a VPU mul at the store (unsaturated slot).
        gathered = jnp.dot(
            onehot,
            w_ref[...],
            preferred_element_type=jnp.float32,
            precision=jax.lax.Precision.HIGHEST,
        )
        out_ref[...] = gathered * jnp.float32(scale)

    grid = (b_pad // tb,)
    grid_spec = pltpu.PrefetchScalarGridSpec(
        num_scalar_prefetch=0,
        grid=grid,
        in_specs=[
            # index tile per batch block
            pl.BlockSpec((tb, F), lambda b: (b, 0)),
            # weight slab: full-array, un-pipelined (single-buffered) VMEM resident
            pl.BlockSpec(memory_space=pltpu.MemorySpace.VMEM),
        ],
        out_specs=pl.BlockSpec((tb, n_pad), lambda b: (b, 0)),
    )

    out = pl.pallas_call(
        kernel,
        out_shape=jax.ShapeDtypeStruct((b_pad, n_pad), jnp.float32),
        grid_spec=grid_spec,
        compiler_params=pltpu.CompilerParams(
            dimension_semantics=("parallel",),  # batch axis shards across TCs (v7x)
        ),
    )(xs, w)

    if b_pad == B and n_pad == n_out:
        return out
    return out[:B, :n_out]


def ticket_embedding_reference(xs, raw_tables, d_model):
    scale = math.sqrt(float(d_model))
    outs = [raw_tables[i][xs[:, i]] for i in range(xs.shape[1])]
    return jnp.concatenate(outs, axis=-1) * scale


if __name__ == "__main__":
    key = jax.random.PRNGKey(0)

    # small synthetic config consistent with the module:
    features = [7, 11, 5]   # vocab sizes
    embed_size = 32         # per-feature embedding dim (int -> replicated)
    B = 16                  # batch (tiled as two blocks of 8 to exercise the grid)

    w, raw_tables, d_model, v_pad, d = make_ticket_embedding_params(key, features, embed_size)

    k_idx = jax.random.fold_in(key, 100)
    cols = []
    for i, f in enumerate(features):
        cols.append(
            jax.random.randint(jax.random.fold_in(k_idx, i), (B,), 0, f, dtype=jnp.int32)
        )
    xs = jnp.stack(cols, axis=1)  # [B, F] int32

    out = ticket_embedding_forward(xs, w, d_model, v_pad, d, tb=8)
    out = jax.block_until_ready(out)

    ref = ticket_embedding_reference(xs, raw_tables, d_model)
    assert out.shape == (B, len(features) * embed_size)
    assert jnp.allclose(out, ref, atol=1e-5, rtol=1e-5), "mismatch vs reference"

    print("KERNEL_OK")
</pallas_src>

<mosaic_0001>
module attributes {stable_mosaic.version = 11 : i64} {
  func.func @kernel(%arg0: i32, %arg1: memref<8x3xi32, #tpu.memory_space<vmem>>, %arg2: memref<33x128xf32, #tpu.memory_space<vmem>>, %arg3: memref<8x128xf32, #tpu.memory_space<vmem>>) attributes {dimension_semantics = [#tpu.dimension_semantics<parallel>], iteration_bounds = array<i64: 2>, scalar_prefetch = 0 : i64, scratch_operands = 0 : i64, tpu.core_type = #tpu.core_type<tc>, window_params = [{transform_indices = @transform_0, window_bounds = array<i64: 8, 3>}, {pipeline_mode = #tpu.pipeline_mode<synchronous>, transform_indices = @transform_1, window_bounds = array<i64: 33, 128>}, {transform_indices = @transform_2, window_bounds = array<i64: 8, 128>}]} {
    %c0 = arith.constant 0 : index
    %c0_0 = arith.constant 0 : index
    %0 = vector.load %arg1[%c0, %c0_0] : memref<8x3xi32, #tpu.memory_space<vmem>>, vector<8x3xi32>
    %1 = tpu.iota {dimensions = array<i32: 1>} : vector<8x33xi32>
    %2 = vector.extract_strided_slice %0 {offsets = [0, 0], sizes = [8, 1], strides = [1, 1]} : vector<8x3xi32> to vector<8x1xi32>
    %3 = vector.broadcast %2 : vector<8x1xi32> to vector<8x33xi32>
    %4 = arith.cmpi eq, %1, %3 : vector<8x33xi32>
    %5 = vector.extract_strided_slice %0 {offsets = [0, 1], sizes = [8, 1], strides = [1, 1]} : vector<8x3xi32> to vector<8x1xi32>
    %c11_i32 = arith.constant 11 : i32
    %6 = vector.broadcast %c11_i32 : i32 to vector<8x1xi32>
    %7 = arith.addi %5, %6 : vector<8x1xi32>
    %8 = vector.broadcast %7 : vector<8x1xi32> to vector<8x33xi32>
    %9 = arith.cmpi eq, %1, %8 : vector<8x33xi32>
    %10 = arith.ori %4, %9 : vector<8x33xi1>
    %11 = vector.extract_strided_slice %0 {offsets = [0, 2], sizes = [8, 1], strides = [1, 1]} : vector<8x3xi32> to vector<8x1xi32>
    %c22_i32 = arith.constant 22 : i32
    %12 = vector.broadcast %c22_i32 : i32 to vector<8x1xi32>
    %13 = arith.addi %11, %12 : vector<8x1xi32>
    %14 = vector.broadcast %13 : vector<8x1xi32> to vector<8x33xi32>
    %15 = arith.cmpi eq, %1, %14 : vector<8x33xi32>
    %16 = arith.ori %10, %15 : vector<8x33xi1>
    %cst = arith.constant 1.000000e+00 : f32
    %cst_1 = arith.constant 0.000000e+00 : f32
    %17 = vector.broadcast %cst : f32 to vector<8x33xf32>
    %18 = vector.broadcast %cst_1 : f32 to vector<8x33xf32>
    %19 = arith.select %16, %17, %18 : vector<8x33xi1>, vector<8x33xf32>
    %c0_2 = arith.constant 0 : index
    %c0_3 = arith.constant 0 : index
    %20 = vector.load %arg2[%c0_2, %c0_3] : memref<33x128xf32, #tpu.memory_space<vmem>>, vector<33x128xf32>
    %cst_4 = arith.constant dense<0.000000e+00> : vector<8x128xf32>
    %21 = tpu.matmul %19, %20, %cst_4 {dimension_numbers = #tpu.dot_dimension_numbers<[1], [0], [0], [1], [0, 0, 1, 1], [], []>, precision = #tpu.contract_precision<fp32>} : vector<8x33xf32>, vector<33x128xf32>, vector<8x128xf32> -> vector<8x128xf32>
    %cst_5 = arith.constant 27.1293201 : f32
    %22 = vector.broadcast %cst_5 : f32 to vector<8x128xf32>
    %23 = arith.mulf %21, %22 : vector<8x128xf32>
    %c0_6 = arith.constant 0 : index
    %c0_7 = arith.constant 0 : index
    %24 = vector.load %arg3[%c0_6, %c0_7] : memref<8x128xf32, #tpu.memory_space<vmem>>, vector<8x128xf32>
    tpu.vector_store %arg3[%c0_6, %c0_7], %23 {strides = array<i32>} : memref<8x128xf32, #tpu.memory_space<vmem>>, vector<8x128xf32>,
    return
  }
  func.func @transform_0(%arg0: i32) -> (i32, i32) {
    %c0_i32 = arith.constant 0 : i32
    %c0_i32_0 = arith.constant 0 : i32
    return %arg0, %c0_i32 : i32, i32
  }
  func.func @transform_1(%arg0: i32) -> (i32, i32) {
    %c0_i32 = arith.constant 0 : i32
    %c0_i32_0 = arith.constant 0 : i32
    %c0_i32_1 = arith.constant 0 : i32
    return %c0_i32, %c0_i32_0 : i32, i32
  }
  func.func @transform_2(%arg0: i32) -> (i32, i32) {
    %c0_i32 = arith.constant 0 : i32
    %c0_i32_0 = arith.constant 0 : i32
    return %arg0, %c0_i32 : i32, i32
  }
}

</mosaic_0001>

<bundles_post_ra>
// kernel: tpu_custom_call.1
= control target key start
LH: loop header
LB: loop body
LE: loop exit
PB: predicated region body
PF: predicated region fallthrough
CT: control target
= control target key end

     0   :  { %7 = vsyncpa [#allocation3], 0  ;;  %s1305_s0 = inlined_call_operand.vmem [shape: s32[16,3], index: 0, kind: input, shape index: {}]   ;;  %s1306_s1 = inlined_call_operand.hbm [shape: f32[33,128], index: 1, kind: input, shape index: {}]   ;;  %s1307_s2 = inlined_call_operand.hbm [shape: f32[16,128], index: 2, kind: output, shape index: {}]  }
   0x1   :  { %8 = vsyncpa [#allocation4], 0 }
   0x2   :  { %10 = vsyncpa [#allocation4 + $0x1], 0  ;;  %s1078_s9 = smov 0   ;;  %s1080_s10 = smov 0  }
   0x3   :  { %s1082_s11 = smov 0   ;;  %s1084_s12 = smov 0  }
   0x4 LB: > { %s1099_s13 = sadd.s32 4294967295, %s1052_s12   ;;  %s772_s14 = sadd.s32 4294967294, %s1052_s12   ;;  %s1052_s12 = sphi %s1084_s12, %s1315_s12   ;;  %s1048_s11 = sphi %s1082_s11, %s1314_s11   ;;  %s1044_s10 = sphi %s1080_s10, %s1313_s10   ;;  %s1040_s9 = sphi %s1078_s9, %s1312_s9  }
   0x5   : > { %s1103_s15 = sadd.s32 1, %s1052_s12   ;;  %s70_s16 = sadd.s32 1, %s1048_s11 }
   0x6   : > { %s67_s17 = ssub.s32 %s1052_s12, %s1103_s15  ;;  %p80_p0 = scmp.ne.s32.totalorder %s1048_s11, %s1044_s10 }
   0x7   : > { %p68_p1 = scmp.eq.s32.totalorder %s67_s17, 0  ;;  %p81_p2 = scmp.eq.s32.totalorder %s1099_s13, 1 }
   0x8   : > { %p86_p3 = scmp.ne.s32.totalorder %s1044_s10, %s1040_s9  ;;  %p87_p4 = scmp.eq.s32.totalorder %s772_s14, 1 }
   0x9   : > { %s1114_s18 = scalar_select %p68_p1, %s1048_s11, %s70_s16  }
   0xa   : > { %p1116_p5 = por %p81_p2, %p80_p0  ;;  %p1120_p6 = por %p87_p4, %p86_p3 }
   0xb   : > { %p773_p7 = scmp.ge.s32.totalorder %s1052_s12, 1  ;;  %p94_p8 = scmp.lt.s32.totalorder %s1052_s12, 3 }
   0xc   : > { %s1309_s20 = scalar_select %p1120_p6, 1, 0 }
   0xd   : > { %p915_p9 = scmp.eq.s32.totalorder %s1099_s13, 0  ;;  %p1127_p10 = pnand %p773_p7, %p94_p8 }
   0xe   : > { %s1054_s22 = smov [#allocation2]  }
   0xf   : > { %s106_s23 = sshll.u32 %s1054_s22, 4  ;;  %p907_p11 = pneg %p1127_p10  ;;  %s107_s23 = int_to_ptr.vmem [resolvable:$true] %s106_s23 }
  0x10   : > { %s973_s24 = scalar_lea.vmem %s107_s23, 640  ;;  %p981_p3 = scmp.lt.s32.totalorder %s107_s23, %s107_s23 }
  0x11   : > { %p908_p12 = pnand %p915_p9, %p907_p11  ;;  %p974_p0 = scmp.ne.s32.totalorder %s107_s23, %s973_s24 }
  0x12   : > { %p982_p4 = scmp.lt.s32.totalorder %s973_s24, %s973_s24 }
  0x13   : > { %p964_p13 = pneg %p908_p12 }
  0x14   : > { %p983_p6 = por %p982_p4, %p981_p3 }
  0x15   : > { %p976_p1 = pnand %p974_p0, %p964_p13 }
  0x17   : > { %p977_p2 = pneg %p976_p1 }
  0x19   : > { %p984_p7 = pnand %p983_p6, %p977_p2 }
  0x1b   : > { %987 = shalt.err (!%p984_p7)
}
  0x1c   : > { %s1055_s25 = smov 128   ;;  %s1056_s26 = smov 8  }
  0x1d   : > { %910 = dma.hbm_to_vmem [thread:$0]  (!%p908_p12), %s1306_s1, 640, %s107_s23, [#allocation3], %s1055_s25, %s1055_s25, %s1056_s26  }
  0x1e   : > { %129 = sbr.rel (%p1127_p10) target bundleno = 419 (0x1a3), region = 28 }
  0x23   : > { %1031 = dma.done.wait (%p915_p9), [#allocation3], 640  }
  0x24   : > { %1033 = vsyncadd (%p915_p9), [#allocation3], 4294966656  ;;  %p150_p8 = scmp.lt.s32.totalorder %s1099_s13, 1  ;;  %v1057_v0 = vmov 0   ;;  %v1058_v1 = vmov 2   ;;  %v1059_v2 = vmov 0.0   ;;  %v155_v38 = vlaneseq }
  0x25   : > { %958 = vset.pattern.permute.xlu0 %v1057_v0  ;;  %960 = vset.pattern.permute.xlu1 %v1058_v1  ;;  %vm183_vm0 = vcmask 1040384   ;;  %v178_v4 = vld [vmem:[#allocation2 + $0x20] sm:$0x1]  ;;  %v177_v5 = vld [vmem:[#allocation2 + $0x18] sm:$0xff]  ;;  %v176_v9 = vld [vmem:[#allocation2 + $0x10] sm:$0xff]  ;;  %v1060_v21 = vmov 1  }
  0x26   : > { %s151_s29 = scalar_select %p150_p8, %s1099_s13, 1  ;;  %836 = vmatprep.subr.mxu1 %v1059_v2  ;;  %823 = vmatprep.subr.mxu0 %v1059_v2  ;;  %v185_v7 = vsel %vm183_vm0, %v178_v4, 0  ;;  %v1151_v8 = vand.u32 4294901760, %v177_v5  ;;  %v175_v10 = vld [vmem:[#allocation2 + $0x8] sm:$0xff]  ;;  %v1155_v13 = vand.u32 4294901760, %v176_v9  ;;  %v174_v15 = vld [vmem:[#allocation2] sm:$0xff] }
  0x27   : > { %v1153_v12 = vand.u32 4294901760, %v185_v7  ;;  %v1157_v14 = vand.u32 4294901760, %v175_v10  ;;  %v1162_v17 = vand.u32 4294901760, %v174_v15  ;;  %vm1061_vm1 = vmmov 0   ;;  %s147_s6 = sand.u32 1, %s1044_s10   ;;  %s784_s8 = sshll.u32 %s1099_s13, 7 }
  0x28   : > { %s779_s30 = sshll.u32 %s151_s29, 3  ;;  %v1160_v16 = vsub.f32 %v177_v5, %v1151_v8  ;;  %v1168_v19 = vsub.f32 %v176_v9, %v1155_v13  ;;  %846 = vmatprep.mubr.msk.f32.mxu1 %vm1061_vm1, %v1059_v2  ;;  %833 = vmatprep.mubr.msk.f32.mxu0 %vm1061_vm1, %v1059_v2  ;;  %v156_v40 = vand.u32 127, %v155_v38  ;;  %vm179_vm6 = vcmask 269312   ;;  %s778_s7 = sshll.u32 %s147_s6, 3 }
  0x29   : > { %s153_s5 = scalar_lea.vmem %s1305_s0, %s779_s30  ;;  %v1165_v18 = vsub.f32 %v185_v7, %v1153_v12  ;;  %v1171_v20 = vsub.f32 %v175_v10, %v1157_v14  ;;  %824 = vmatpush3.msra.mxu0 %v1153_v12  ;;  %v1176_v23 = vsub.f32 %v174_v15, %v1162_v17  ;;  %s149_s14 = scalar_lea.vmem [#allocation5], %s778_s7 }
  0x2a   : > { %v154_v3 = vld [vmem:[%s153_s5] sm:$0xff]  ;;  %v299_v22 = vand.u32 4294901760, %v1160_v16  ;;  %v306_v25 = vand.u32 4294901760, %v1168_v19  ;;  %825 = vmatprep.subr.mxu0 %v1059_v2  ;;  %s701_s16 = sshll.u32 %s149_s14, 4  ;;  %s699_s22 = scalar_lea.hbm %s1307_s2, %s784_s8  ;;  %s702_s16 = int_to_ptr.vmem [resolvable:$true] %s701_s16 }
  0x2b   : > { %158 = vperm.xlu0 %958, %v154_v3   ;;  %v167_v6 = vadd.s32 22, %v154_v3  ;;  %v161_v11 = vadd.s32 11, %v154_v3  ;;  %v292_v24 = vand.u32 4294901760, %v1165_v18  ;;  %v313_v26 = vand.u32 4294901760, %v1171_v20  ;;  %826 = vmatpush3.msra.mxu0 %v1151_v8  ;;  %s688_s23 = scalar_lea.sflag [#allocation4], %s147_s6  ;;  %s988_s24 = scalar_lea.vmem %s702_s16, 128 }
  0x2c   : > { %v300_v27 = vsub.f32 %v1160_v16, %v299_v22  ;;  %v307_v29 = vsub.f32 %v1168_v19, %v306_v25  ;;  %v320_v30 = vand.u32 4294901760, %v1176_v23  ;;  %827 = vmatprep.subr.mxu0 %v1059_v2  ;;  %p989_p6 = scmp.ne.s32.totalorder %s702_s16, %s988_s24  ;;  %s1062_s25 = smov [#allocation5]  }
  0x2d   : > { %169 = vperm.xlu1 %960, %v167_v6   ;;  %v293_v28 = vsub.f32 %v1165_v18, %v292_v24  ;;  %828 = vmatpush3.msra.mxu0 %v1155_v13  ;;  %v314_v33 = vsub.f32 %v1171_v20, %v313_v26  ;;  %s992_s26 = sshll.u32 %s1062_s25, 4  ;;  %s993_s26 = int_to_ptr.vmem [resolvable:$false] %s992_s26 }
  0x2e   : > { %v301_v32 = vand.u32 4294901760, %v300_v27  ;;  %829 = vmatprep.subr.mxu0 %v1059_v2  ;;  %v308_v34 = vand.u32 4294901760, %v307_v29  ;;  %v321_v35 = vsub.f32 %v1176_v23, %v320_v30  ;;  %p990_p9 = pnand %p989_p6, %p1116_p5  ;;  %s994_s13 = scalar_lea.vmem %s993_s26, 256 }
  0x2f   : > { %959 = vset.pattern.permute.xlu0 %v1060_v21  ;;  %v294_v31 = vand.u32 4294901760, %v293_v28  ;;  %830 = vmatpush3.msra.mxu0 %v1157_v14  ;;  %v315_v36 = vand.u32 4294901760, %v314_v33  ;;  %p995_p11 = scmp.lt.s32.totalorder %s702_s16, %s993_s26  ;;  %p996_p12 = scmp.lt.s32.totalorder %s994_s13, %s988_s24 }
  0x30   : > { %163 = vperm.xlu0 %959, %v161_v11   ;;  %831 = vmatprep.subr.mxu0 %v1059_v2  ;;  %v322_v37 = vand.u32 4294901760, %v321_v35  ;;  %p991_p10 = pneg %p990_p9 }
  0x31   : > { %837 = vmatpush3.msra.mxu1 %v294_v31  ;;  %832 = vmatpush3.msra.mxu0 %v1162_v17  ;;  %p997_p13 = por %p996_p12, %p995_p11 }
  0x32   : > { %838 = vmatprep.subr.mxu1 %v1059_v2  ;;  %849 = vmatprep.subr.mxu0 %v1059_v2 }
  0x33   : > { %839 = vmatpush3.msra.mxu1 %v301_v32  ;;  %p998_p0 = pnand %p997_p13, %p991_p10 }
  0x34   : > { %961 = vset.pattern.permute.xlu0 %v1058_v1  ;;  %840 = vmatprep.subr.mxu1 %v1059_v2 }
  0x35   : > { %841 = vmatpush3.msra.mxu1 %v308_v34 }
  0x36   : > { %842 = vmatprep.subr.mxu1 %v1059_v2 }
  0x37   : > { %843 = vmatpush3.msra.mxu1 %v315_v36 }
  0x38   : > { %844 = vmatprep.subr.mxu1 %v1059_v2 }
  0x39   : > { %845 = vmatpush3.msra.mxu1 %v322_v37 }
  0x3a   : > { %862 = vmatprep.subr.mxu1 %v1059_v2 }
  0xa6   : > { %v159_v39 = vpop.permute.xlu0 %158 }
  0xa7   : > { %vm160_vm3 = vcmp.eq.s32.totalorder %v156_v40, %v159_v39 }
  0xa8   : > { %v170_v41 = vpop.permute.xlu1 %169 }
  0xa9   : > { %vm171_vm2 = vcmp.eq.s32.totalorder %v156_v40, %v170_v41 }
  0xab   : > { %v164_v42 = vpop.permute.xlu0 %163 }
  0xac   : > { %vm165_vm4 = vcmp.eq.s32.totalorder %v156_v40, %v164_v42 }
  0xad   : > { %vm166_vm5 = vmor %vm160_vm3, %vm165_vm4 }
  0xae   : > { %vm172_vm7 = vmor %vm166_vm5, %vm171_vm2 }
  0xaf   : > { %v173_v43 = vsel %vm172_vm7, 1.0, %v1059_v2 }
  0xb0   : > { %v181_v44 = vsel %vm179_vm6, %v173_v43, 0  ;;  %847 = vmatmul.mubr.msk.f32.vlgmr.msra.gmra.mxu1 %vm179_vm6, %v173_v43 }
  0xb1   : > { %v258_v45 = vsub.f32 %v181_v44, %v181_v44  ;;  %863 = vmatpush3.msra.mxu1 %v1153_v12  ;;  %872 = vmatprep.mubr.msk.f32.mxu1 %vm1061_vm1, %v1059_v2 }
  0xb2   : > { %864 = vmatprep.subr.mxu1 %v1059_v2 }
  0xb3   : > { %865 = vmatpush3.msra.mxu1 %v1151_v8  ;;  %v259_v46 = vand.u32 4294901760, %v258_v45 }
  0xb4   : > { %866 = vmatprep.subr.mxu1 %v1059_v2 }
  0xb5   : > { %867 = vmatpush3.msra.mxu1 %v1155_v13  ;;  %v260_v47 = vsub.f32 %v258_v45, %v259_v46 }
  0xb6   : > { %868 = vmatprep.subr.mxu1 %v1059_v2 }
  0xb7   : > { %869 = vmatpush3.msra.mxu1 %v1157_v14  ;;  %v261_v48 = vand.u32 4294901760, %v260_v47 }
  0xb8   : > { %870 = vmatprep.subr.mxu1 %v1059_v2 }
  0xb9   : > { %871 = vmatpush3.msra.mxu1 %v1162_v17  ;;  %834 = vmatmul.mubr.f32.vlgmr.msra.gmra.mxu0 %v261_v48 }
  0xba   : > { %850 = vmatpush3.msra.mxu0 %v1165_v18  ;;  %873 = vmatmul.mubr.f32.vlgmr.msra.gmra.mxu1 %v259_v46 }
  0xbb   : > { %888 = vmatprep.subr.mxu1 %v1059_v2  ;;  %851 = vmatprep.subr.mxu0 %v1059_v2 }
  0xbc   : > { %889 = vmatpush3.msra.mxu1 %v1153_v12  ;;  %852 = vmatpush3.msra.mxu0 %v1160_v16 }
  0xbd   : > { %890 = vmatprep.subr.mxu1 %v1059_v2  ;;  %853 = vmatprep.subr.mxu0 %v1059_v2 }
  0xbe   : > { %891 = vmatpush3.msra.mxu1 %v1151_v8  ;;  %854 = vmatpush3.msra.mxu0 %v1168_v19 }
  0xbf   : > { %892 = vmatprep.subr.mxu1 %v1059_v2  ;;  %855 = vmatprep.subr.mxu0 %v1059_v2 }
  0xc0   : > { %893 = vmatpush3.msra.mxu1 %v1155_v13  ;;  %856 = vmatpush3.msra.mxu0 %v1171_v20 }
  0xc1   : > { %894 = vmatprep.subr.mxu1 %v1059_v2  ;;  %857 = vmatprep.subr.mxu0 %v1059_v2 }
  0xc2   : > { %895 = vmatpush3.msra.mxu1 %v1157_v14  ;;  %858 = vmatpush3.msra.mxu0 %v1176_v23 }
  0xc3   : > { %859 = vmatprep.mubr.msk.f32.mxu0 %vm1061_vm1, %v1059_v2  ;;  %896 = vmatprep.subr.mxu1 %v1059_v2 }
  0xc4   : > { %860 = vmatmul.mubr.f32.vlgmr.msra.gmra.mxu0 %v258_v45  ;;  %875 = vmatprep.subr.mxu0 %v1059_v2 }
  0xc5   : > { %897 = vmatpush3.msra.mxu1 %v1162_v17  ;;  %898 = vmatprep.mubr.msk.f32.mxu1 %vm1061_vm1, %v1059_v2 }
  0xc6   : > { %876 = vmatpush3.msra.mxu0 %v292_v24  ;;  %899 = vmatmul.mubr.msk.f32.vlgmr.msra.gmra.mxu1 %vm179_vm6, %v173_v43 }
  0xc7   : > { %877 = vmatprep.subr.mxu0 %v1059_v2  ;;  %885 = vmatprep.mubr.msk.f32.mxu0 %vm1061_vm1, %v1059_v2 }
  0xc8   : > { %878 = vmatpush3.msra.mxu0 %v299_v22 }
  0xc9   : > { %879 = vmatprep.subr.mxu0 %v1059_v2 }
  0xca   : > { %880 = vmatpush3.msra.mxu0 %v306_v25 }
  0xcb   : > { %881 = vmatprep.subr.mxu0 %v1059_v2 }
  0xcc   : > { %882 = vmatpush3.msra.mxu0 %v313_v26 }
  0xcd   : > { %883 = vmatprep.subr.mxu0 %v1059_v2 }
  0xce   : > { %884 = vmatpush3.msra.mxu0 %v320_v30 }
  0xcf   : > { %886 = vmatmul.mubr.msk.f32.vlgmr.msra.gmra.mxu0 %vm179_vm6, %v173_v43 }
 0x170   : > { %v359_v49 = vpop.f32.mrf.mxu1 }
 0x172   : > { %v848_v50 = vpop.f32.mrf.mxu1 }
 0x179   : > { %v263_v51 = vpop.f32.mrf.mxu0 }
 0x17a   : > { %v519_v52 = vpop.f32.mrf.mxu1  ;;  %v360_v58 = vadd.f32 %v359_v49, %v263_v51 }
 0x17b   : > { %v835_v53 = vpop.f32.mrf.mxu0 }
 0x17c   : > { %v874_v54 = vpop.f32.mrf.mxu1 }
 0x184   : > { %v441_v55 = vpop.f32.mrf.mxu0 }
 0x185   : > { %v442_v60 = vadd.f32 %v441_v55, %v360_v58 }
 0x186   : > { %v681_v56 = vpop.f32.mrf.mxu1  ;;  %v861_v57 = vpop.f32.mrf.mxu0 }
 0x187   : > { %v520_v61 = vadd.f32 %v519_v52, %v442_v60 }
 0x188   : > { %v900_v59 = vpop.f32.mrf.mxu1 }
 0x18f   : > { %v605_v62 = vpop.f32.mrf.mxu0 }
 0x190   : > { %v606_v63 = vadd.f32 %v605_v62, %v520_v61 }
 0x191   : > { %v887_v0 = vpop.f32.mrf.mxu0 }
 0x192   : > { %v682_v1 = vadd.f32 %v681_v56, %v606_v63 }
 0x194   : > { %v685_v2 = vmul.f32 27.12932, %v682_v1 }
 0x196   : > { %686 = vst [vmem:[%s149_s14] sm:$0xff] %v685_v2 }
 0x197   : > { %1001 = shalt.err (!%p998_p0)
}
 0x198   : > { %s1002_s27 = scalar_lea.hbm %s699_s22, 128  ;;  %s1006_s30 = scalar_lea.hbm %s1307_s2, 256 }
 0x199   : > { %p1003_p1 = scmp.ne.s32.totalorder %s699_s22, %s1002_s27  ;;  %p1007_p4 = scmp.lt.s32.totalorder %s699_s22, %s1307_s2 }
 0x19a   : > { %p1008_p7 = scmp.lt.s32.totalorder %s1006_s30, %s1002_s27 }
 0x19b   : > { %p1004_p2 = pnand %p1003_p1, %p1116_p5 }
 0x19c   : > { %p1009_p8 = por %p1008_p7, %p1007_p4 }
 0x19d   : > { %p1005_p3 = pneg %p1004_p2 }
 0x19f   : > { %p1010_p6 = pnand %p1009_p8, %p1005_p3 }
 0x1a1   : > { %1013 = shalt.err (!%p1010_p6)
}
 0x1a2   : > { %905 = dma.vmem_to_hbm [thread:$0]  (%p1116_p5), %s702_s16, 128, %s699_s22, %s688_s23  }
 0x1a3 PF: > { %p917_p9 = scmp.ge.s32.totalorder %s1052_s12, 2  ;;  %s713_s5 = sand.u32 1, %s1040_s9  }
 0x1a4   : > { %p1311_p10 = scmp.ne.s32.totalorder %s1309_s20, 0  ;;  %s714_s6 = scalar_lea.sflag [#allocation4], %s713_s5 }
 0x1a6   : > { %p912_p11 = pnand %p917_p9, %p1311_p10 }
 0x1a8   : > { %p913_p12 = pneg %p912_p11 }
 0x1aa   : > { %1035 = dma.done.wait (%p913_p12), %s714_s6, 128  }
 0x1ab   : > { %1037 = vsyncadd (%p913_p12), %s714_s6, 4294967168  ;;  %p13_p13 = scmp.ge.s32.totalorder %s1103_s15, 4   ;;  %s1312_s9 = smov %s1044_s10 }
 0x1ac   : > { %s1313_s10 = smov %s1048_s11  ;;  %s1314_s11 = smov %s1114_s18 }
 0x1ad   : > { %s1315_s12 = smov %s1103_s15  ;;  %15 = sbr.rel (!%p13_p13) target bundleno = 4 (0x4), region = 68 }
 0x1b2   :  { %719 = vsyncpa [#allocation3], 1 }
 0x1b3   :  { %721 = vsyncpa [#allocation3 + $0x1], 1 }
 0x1b4   :  { %722 = vsyncpa [#allocation4], 1 }
 0x1b5   :  { %724 = vsyncpa [#allocation4 + $0x1], 1 }

</bundles_post_ra>
